<compile_context>
chip_gen: v7x
topology: tpu7x:2x2x1
jax: 0.10.0
libtpu: 0.0.40
codegen_flags: <defaults>
</compile_context>

<pallas_src>
import functools

import numpy as np
import jax
import jax.numpy as jnp
from jax.experimental import pallas as pl
from jax.experimental.pallas import tpu as pltpu


# ---------------------------------------------------------------------------
# Constant construction (deterministic, matches the PyTorch module __init__)
# ---------------------------------------------------------------------------
_LUMA_TBL = np.array(
    [[16, 11, 10, 16, 24, 40, 51, 61],
     [12, 12, 14, 19, 26, 58, 60, 55],
     [14, 13, 16, 24, 40, 57, 69, 56],
     [14, 17, 22, 29, 51, 87, 80, 62],
     [18, 22, 37, 56, 68, 109, 103, 77],
     [24, 35, 55, 64, 81, 104, 113, 92],
     [49, 64, 78, 87, 103, 121, 120, 101],
     [72, 92, 95, 98, 112, 100, 103, 99]], dtype=np.float32)

_CHROMA_TBL = np.array(
    [[17, 18, 24, 47, 99, 99, 99, 99],
     [18, 21, 26, 66, 99, 99, 99, 99],
     [24, 26, 56, 99, 99, 99, 99, 99],
     [47, 66, 99, 99, 99, 99, 99, 99],
     [99, 99, 99, 99, 99, 99, 99, 99],
     [99, 99, 99, 99, 99, 99, 99, 99],
     [99, 99, 99, 99, 99, 99, 99, 99],
     [99, 99, 99, 99, 99, 99, 99, 99]], dtype=np.float32)


def _dct_coff():
    c = np.zeros((8, 8), dtype=np.float32)
    c[0, :] = np.sqrt(1.0 / 8.0)
    for i in range(1, 8):
        for j in range(8):
            c[i, j] = np.cos(np.pi * i * (2 * j + 1) / 16.0) * np.sqrt(2.0 / 8.0)
    return c


def _base_constants(Q):
    """Un-fused constants (used by the pure-JAX reference)."""
    scale = 2.0 - Q * 0.02 if Q >= 50 else 50.0 / Q
    ql = np.maximum(np.round(_LUMA_TBL * scale), 1.0).reshape(64).astype(np.float32)
    qc = np.maximum(np.round(_CHROMA_TBL * scale), 1.0).reshape(64).astype(np.float32)
    c8 = _dct_coff()
    D = np.kron(c8, c8).astype(np.float32)   # inverse op (row form): x = y @ D
    DT = np.ascontiguousarray(D.T)           # forward op (row form): y = x @ DT
    return D, DT, ql, qc


def _fused_operators(Q):
    """128x128 block-diagonal (2 packed 8x8 blocks per row) DCT operators with
    the quantization tables folded in: forward includes the /q, inverse the *q."""
    D, DT, ql, qc = _base_constants(Q)

    def pack2(m):
        return np.kron(np.eye(2, dtype=np.float32), m).astype(np.float32)

    dt_l = pack2(DT * (1.0 / ql)[None, :])   # forward, luminance
    dt_c = pack2(DT * (1.0 / qc)[None, :])   # forward, chrominance
    d_l = pack2(ql[:, None] * D)             # inverse, luminance
    d_c = pack2(qc[:, None] * D)             # inverse, chrominance
    return tuple(jnp.asarray(m) for m in (dt_l, dt_c, d_l, d_c))


# ---------------------------------------------------------------------------
# Pallas kernel
# ---------------------------------------------------------------------------
def _jpeg_ss_kernel(x_ref, dtl_ref, dtc_ref, dl_ref, dc_ref, o_ref):
    # x_ref/o_ref: (3, TB, 128) packed RGB block rows; operators: (128, 128).
    r = (jnp.clip(x_ref[0], -1.0, 1.0) + 1.0) * (255.0 / 2.0)
    g = (jnp.clip(x_ref[1], -1.0, 1.0) + 1.0) * (255.0 / 2.0)
    b = (jnp.clip(x_ref[2], -1.0, 1.0) + 1.0) * (255.0 / 2.0)

    # rgb -> yuv
    y = 0.299 * r + 0.587 * g + 0.114 * b
    u = -0.1687 * r - 0.3313 * g + 0.5 * b
    v = 0.5 * r - 0.4187 * g - 0.0813 * b

    # TODO(synk): subsample==2 chroma subsampling not implemented (module default subsample=0).

    dt_l = dtl_ref[...]
    dt_c = dtc_ref[...]
    d_l = dl_ref[...]
    d_c = dc_ref[...]

    # forward block DCT with the quantization divide folded into the operator
    yq = jnp.dot(y, dt_l, preferred_element_type=jnp.float32)
    uq = jnp.dot(u, dt_c, preferred_element_type=jnp.float32)
    vq = jnp.dot(v, dt_c, preferred_element_type=jnp.float32)

    def round_ss(t):
        return jnp.where(jnp.abs(t) < 0.5, t * t * t, t)

    yq = round_ss(yq)
    uq = round_ss(uq)
    vq = round_ss(vq)

    # inverse block DCT with the de-quantization multiply folded into the operator
    yi = jnp.dot(yq, d_l, preferred_element_type=jnp.float32)
    ui = jnp.dot(uq, d_c, preferred_element_type=jnp.float32)
    vi = jnp.dot(vq, d_c, preferred_element_type=jnp.float32)

    # yuv -> rgb
    rr = yi + 1.40198758 * vi
    gg = yi - 0.344113281 * ui - 0.714103821 * vi
    bb = yi + 1.77197812 * ui

    def back(t):
        return jnp.clip(t * (2.0 / 255.0) - 1.0, -1.0, 1.0)

    o_ref[0] = back(rr)
    o_ref[1] = back(gg)
    o_ref[2] = back(bb)


# ---------------------------------------------------------------------------
# Glue: NCHW <-> block layouts, padding, tile selection, pallas_call wrapper
# ---------------------------------------------------------------------------
def _to_blocks(x):
    # (N,3,H,W) -> (3, N*(H/8)*(W/8), 64), 64 = row-major flattened 8x8 block
    N, C, H, W = x.shape
    xb = x.reshape(N, C, H // 8, 8, W // 8, 8)
    xb = xb.transpose(1, 0, 2, 4, 3, 5)          # (C, N, H/8, W/8, 8, 8)
    return xb.reshape(C, N * (H // 8) * (W // 8), 64)


def _from_blocks(xb, N, H, W):
    C = xb.shape[0]
    x = xb.reshape(C, N, H // 8, W // 8, 8, 8)
    x = x.transpose(1, 0, 2, 4, 3, 5)            # (N, C, H/8, 8, W/8, 8)
    return x.reshape(N, C, H, W)


def _round_up(x, m):
    return (x + m - 1) // m * m


def _choose_tile_rows(b2r):
    """Pick the per-step tile rows (packed 128-lane rows). b2r is a multiple of 8.
    Large enough to amortize pipeline overhead / fill the MXU, small enough to
    fit default scoped VMEM on v5e/v6e/v7x, and >=2 grid steps when possible so
    the 'parallel' axis can be split across v7x's two TensorCores."""
    if b2r >= 2048:
        return 1024
    if b2r >= 16:
        cap = max(8, min(1024, (b2r // 2) // 8 * 8))
        for tb in range(cap, 7, -8):
            if b2r % tb == 0:
                return tb
        return 8
    return 8


@functools.partial(jax.jit, static_argnames=("Q", "subsample"))
def jpeg_ss(image, Q=50, subsample=0):
    """Differentiable JPEG (JpegSS.forward). image: (N,3,H,W) float32 in [-1,1]."""
    assert subsample == 0, "only subsample=0 (module default) is implemented"
    N, C, H, W = image.shape
    assert C == 3

    pad_h = (8 - H % 8) % 8
    pad_w = (8 - W % 8) % 8
    # nn.ZeroPad2d is applied after the [0,255] rescale in the module; a zero
    # pixel there equals a clamped -1 input pixel, so padding with -1 here is exact.
    img = jnp.pad(image.astype(jnp.float32),
                  ((0, 0), (0, 0), (0, pad_h), (0, pad_w)),
                  constant_values=-1.0)
    Hp, Wp = H + pad_h, W + pad_w

    dt_l, dt_c, d_l, d_c = _fused_operators(Q)

    xb = _to_blocks(img)                           # (3, B, 64)
    B = xb.shape[1]
    B2 = -(-B // 2)                                # packed rows (2 blocks per row)
    B2r = _round_up(max(B2, 1), 8)
    TB = _choose_tile_rows(B2r)
    B2p = _round_up(B2r, TB)
    grid = (B2p // TB,)

    # pad block count up to 2*B2p, then pack two blocks per 128-lane row
    xb = jnp.pad(xb, ((0, 0), (0, 2 * B2p - B), (0, 0)), constant_values=-1.0)
    xp = xb.reshape(3, B2p, 128)

    out = pl.pallas_call(
        _jpeg_ss_kernel,
        out_shape=jax.ShapeDtypeStruct((3, B2p, 128), jnp.float32),
        grid_spec=pltpu.PrefetchScalarGridSpec(
            num_scalar_prefetch=0,
            grid=grid,
            in_specs=[
                pl.BlockSpec((3, TB, 128), lambda i: (0, i, 0)),
                pl.BlockSpec((128, 128), lambda i: (0, 0)),
                pl.BlockSpec((128, 128), lambda i: (0, 0)),
                pl.BlockSpec((128, 128), lambda i: (0, 0)),
                pl.BlockSpec((128, 128), lambda i: (0, 0)),
            ],
            out_specs=pl.BlockSpec((3, TB, 128), lambda i: (0, i, 0)),
        ),
        compiler_params=pltpu.CompilerParams(
            dimension_semantics=("parallel",)),
    )(xp, dt_l, dt_c, d_l, d_c)

    outb = out.reshape(3, 2 * B2p, 64)[:, :B, :]
    noised = _from_blocks(outb, N, Hp, Wp)
    return noised[:, :, :H, :W]


# ---------------------------------------------------------------------------
# Pure-JAX reference (same math, un-fused operators, no Pallas) sanity check
# ---------------------------------------------------------------------------
def _jpeg_ss_ref(image, Q=50):
    N, C, H, W = image.shape
    pad_h = (8 - H % 8) % 8
    pad_w = (8 - W % 8) % 8
    img = jnp.pad(jnp.asarray(image, jnp.float32),
                  ((0, 0), (0, 0), (0, pad_h), (0, pad_w)),
                  constant_values=-1.0)
    Hp, Wp = H + pad_h, W + pad_w

    D_np, DT_np, ql_np, qc_np = _base_constants(Q)
    D, DT = jnp.asarray(D_np), jnp.asarray(DT_np)
    ql = jnp.asarray(ql_np)[None, :]
    qc = jnp.asarray(qc_np)[None, :]

    xb = _to_blocks(img)
    r = (jnp.clip(xb[0], -1.0, 1.0) + 1.0) * 255.0 / 2.0
    g = (jnp.clip(xb[1], -1.0, 1.0) + 1.0) * 255.0 / 2.0
    b = (jnp.clip(xb[2], -1.0, 1.0) + 1.0) * 255.0 / 2.0
    y = 0.299 * r + 0.587 * g + 0.114 * b
    u = -0.1687 * r - 0.3313 * g + 0.5 * b
    v = 0.5 * r - 0.4187 * g - 0.0813 * b

    mm = lambda a, m: jnp.dot(a, m, precision=jax.lax.Precision.HIGHEST)
    rnd = lambda t: jnp.where(jnp.abs(t) < 0.5, t ** 3, t)
    yq = rnd(mm(y, DT) / ql) * ql
    uq = rnd(mm(u, DT) / qc) * qc
    vq = rnd(mm(v, DT) / qc) * qc
    yi, ui, vi = mm(yq, D), mm(uq, D), mm(vq, D)

    rr = yi + 1.40198758 * vi
    gg = yi - 0.344113281 * ui - 0.714103821 * vi
    bb = yi + 1.77197812 * ui
    back = lambda t: jnp.clip(t * 2.0 / 255.0 - 1.0, -1.0, 1.0)
    out = jnp.stack([back(rr), back(gg), back(bb)], axis=0)
    return _from_blocks(out, N, Hp, Wp)[:, :, :H, :W]


if __name__ == "__main__":
    key = jax.random.PRNGKey(0)
    k1, k2 = jax.random.split(key)

    # image in [-1, 1], NCHW, RGB, spatial multiple of 8
    x = jax.random.uniform(k1, (2, 3, 16, 16), jnp.float32, minval=-1.0, maxval=1.0)
    out = jax.block_until_ready(jpeg_ss(x, Q=50, subsample=0))
    assert out.shape == x.shape and out.dtype == jnp.float32
    ref = _jpeg_ss_ref(x, Q=50)
    np.testing.assert_allclose(np.asarray(out), np.asarray(ref), atol=2e-2, rtol=0)

    # also exercise the non-multiple-of-8 padding path
    x2 = jax.random.uniform(k2, (1, 3, 12, 20), jnp.float32, minval=-1.0, maxval=1.0)
    out2 = jax.block_until_ready(jpeg_ss(x2, Q=75, subsample=0))
    assert out2.shape == x2.shape and out2.dtype == jnp.float32
    ref2 = _jpeg_ss_ref(x2, Q=75)
    np.testing.assert_allclose(np.asarray(out2), np.asarray(ref2), atol=2e-2, rtol=0)

    print("KERNEL_OK")
</pallas_src>

<mosaic_0001>
module attributes {stable_mosaic.version = 11 : i64} {
  func.func @_jpeg_ss_kernel(%arg0: i32, %arg1: memref<3x8x128xf32, #tpu.memory_space<vmem>>, %arg2: memref<128x128xf32, #tpu.memory_space<vmem>>, %arg3: memref<128x128xf32, #tpu.memory_space<vmem>>, %arg4: memref<128x128xf32, #tpu.memory_space<vmem>>, %arg5: memref<128x128xf32, #tpu.memory_space<vmem>>, %arg6: memref<3x8x128xf32, #tpu.memory_space<vmem>>) attributes {dimension_semantics = [#tpu.dimension_semantics<parallel>], iteration_bounds = array<i64: 1>, scalar_prefetch = 0 : i64, scratch_operands = 0 : i64, tpu.core_type = #tpu.core_type<tc>, window_params = [{transform_indices = @transform_0, window_bounds = array<i64: 3, 8, 128>}, {pipeline_mode = #tpu.pipeline_mode<synchronous>, transform_indices = @transform_1, window_bounds = array<i64: 128, 128>}, {pipeline_mode = #tpu.pipeline_mode<synchronous>, transform_indices = @transform_2, window_bounds = array<i64: 128, 128>}, {pipeline_mode = #tpu.pipeline_mode<synchronous>, transform_indices = @transform_3, window_bounds = array<i64: 128, 128>}, {pipeline_mode = #tpu.pipeline_mode<synchronous>, transform_indices = @transform_4, window_bounds = array<i64: 128, 128>}, {transform_indices = @transform_5, window_bounds = array<i64: 3, 8, 128>}]} {
    %c0 = arith.constant 0 : index
    %c0_0 = arith.constant 0 : index
    %c0_1 = arith.constant 0 : index
    %0 = vector.load %arg1[%c0, %c0_0, %c0_1] : memref<3x8x128xf32, #tpu.memory_space<vmem>>, vector<1x8x128xf32>
    %1 = vector.shape_cast %0 : vector<1x8x128xf32> to vector<8x128xf32>
    %cst = arith.constant -1.000000e+00 : f32
    %cst_2 = arith.constant 1.000000e+00 : f32
    %2 = vector.broadcast %cst : f32 to vector<8x128xf32>
    %3 = arith.maximumf %2, %1 : vector<8x128xf32>
    %4 = vector.broadcast %cst_2 : f32 to vector<8x128xf32>
    %5 = arith.minimumf %4, %3 : vector<8x128xf32>
    %cst_3 = arith.constant 1.000000e+00 : f32
    %6 = vector.broadcast %cst_3 : f32 to vector<8x128xf32>
    %7 = arith.addf %5, %6 : vector<8x128xf32>
    %cst_4 = arith.constant 1.275000e+02 : f32
    %8 = vector.broadcast %cst_4 : f32 to vector<8x128xf32>
    %9 = arith.mulf %7, %8 : vector<8x128xf32>
    %c1 = arith.constant 1 : index
    %c0_5 = arith.constant 0 : index
    %c0_6 = arith.constant 0 : index
    %10 = vector.load %arg1[%c1, %c0_5, %c0_6] : memref<3x8x128xf32, #tpu.memory_space<vmem>>, vector<1x8x128xf32>
    %11 = vector.shape_cast %10 : vector<1x8x128xf32> to vector<8x128xf32>
    %cst_7 = arith.constant -1.000000e+00 : f32
    %cst_8 = arith.constant 1.000000e+00 : f32
    %12 = vector.broadcast %cst_7 : f32 to vector<8x128xf32>
    %13 = arith.maximumf %12, %11 : vector<8x128xf32>
    %14 = vector.broadcast %cst_8 : f32 to vector<8x128xf32>
    %15 = arith.minimumf %14, %13 : vector<8x128xf32>
    %cst_9 = arith.constant 1.000000e+00 : f32
    %16 = vector.broadcast %cst_9 : f32 to vector<8x128xf32>
    %17 = arith.addf %15, %16 : vector<8x128xf32>
    %cst_10 = arith.constant 1.275000e+02 : f32
    %18 = vector.broadcast %cst_10 : f32 to vector<8x128xf32>
    %19 = arith.mulf %17, %18 : vector<8x128xf32>
    %c2 = arith.constant 2 : index
    %c0_11 = arith.constant 0 : index
    %c0_12 = arith.constant 0 : index
    %20 = vector.load %arg1[%c2, %c0_11, %c0_12] : memref<3x8x128xf32, #tpu.memory_space<vmem>>, vector<1x8x128xf32>
    %21 = vector.shape_cast %20 : vector<1x8x128xf32> to vector<8x128xf32>
    %cst_13 = arith.constant -1.000000e+00 : f32
    %cst_14 = arith.constant 1.000000e+00 : f32
    %22 = vector.broadcast %cst_13 : f32 to vector<8x128xf32>
    %23 = arith.maximumf %22, %21 : vector<8x128xf32>
    %24 = vector.broadcast %cst_14 : f32 to vector<8x128xf32>
    %25 = arith.minimumf %24, %23 : vector<8x128xf32>
    %cst_15 = arith.constant 1.000000e+00 : f32
    %26 = vector.broadcast %cst_15 : f32 to vector<8x128xf32>
    %27 = arith.addf %25, %26 : vector<8x128xf32>
    %cst_16 = arith.constant 1.275000e+02 : f32
    %28 = vector.broadcast %cst_16 : f32 to vector<8x128xf32>
    %29 = arith.mulf %27, %28 : vector<8x128xf32>
    %cst_17 = arith.constant 2.990000e-01 : f32
    %30 = vector.broadcast %cst_17 : f32 to vector<8x128xf32>
    %31 = arith.mulf %30, %9 : vector<8x128xf32>
    %cst_18 = arith.constant 5.870000e-01 : f32
    %32 = vector.broadcast %cst_18 : f32 to vector<8x128xf32>
    %33 = arith.mulf %32, %19 : vector<8x128xf32>
    %34 = arith.addf %31, %33 : vector<8x128xf32>
    %cst_19 = arith.constant 1.140000e-01 : f32
    %35 = vector.broadcast %cst_19 : f32 to vector<8x128xf32>
    %36 = arith.mulf %35, %29 : vector<8x128xf32>
    %37 = arith.addf %34, %36 : vector<8x128xf32>
    %cst_20 = arith.constant -1.687000e-01 : f32
    %38 = vector.broadcast %cst_20 : f32 to vector<8x128xf32>
    %39 = arith.mulf %38, %9 : vector<8x128xf32>
    %cst_21 = arith.constant 3.313000e-01 : f32
    %40 = vector.broadcast %cst_21 : f32 to vector<8x128xf32>
    %41 = arith.mulf %40, %19 : vector<8x128xf32>
    %42 = arith.subf %39, %41 : vector<8x128xf32>
    %cst_22 = arith.constant 5.000000e-01 : f32
    %43 = vector.broadcast %cst_22 : f32 to vector<8x128xf32>
    %44 = arith.mulf %43, %29 : vector<8x128xf32>
    %45 = arith.addf %42, %44 : vector<8x128xf32>
    %cst_23 = arith.constant 5.000000e-01 : f32
    %46 = vector.broadcast %cst_23 : f32 to vector<8x128xf32>
    %47 = arith.mulf %46, %9 : vector<8x128xf32>
    %cst_24 = arith.constant 4.187000e-01 : f32
    %48 = vector.broadcast %cst_24 : f32 to vector<8x128xf32>
    %49 = arith.mulf %48, %19 : vector<8x128xf32>
    %50 = arith.subf %47, %49 : vector<8x128xf32>
    %cst_25 = arith.constant 0.0812999978 : f32
    %51 = vector.broadcast %cst_25 : f32 to vector<8x128xf32>
    %52 = arith.mulf %51, %29 : vector<8x128xf32>
    %53 = arith.subf %50, %52 : vector<8x128xf32>
    %c0_26 = arith.constant 0 : index
    %c0_27 = arith.constant 0 : index
    %54 = vector.load %arg2[%c0_26, %c0_27] : memref<128x128xf32, #tpu.memory_space<vmem>>, vector<128x128xf32>
    %c0_28 = arith.constant 0 : index
    %c0_29 = arith.constant 0 : index
    %55 = vector.load %arg3[%c0_28, %c0_29] : memref<128x128xf32, #tpu.memory_space<vmem>>, vector<128x128xf32>
    %c0_30 = arith.constant 0 : index
    %c0_31 = arith.constant 0 : index
    %56 = vector.load %arg4[%c0_30, %c0_31] : memref<128x128xf32, #tpu.memory_space<vmem>>, vector<128x128xf32>
    %c0_32 = arith.constant 0 : index
    %c0_33 = arith.constant 0 : index
    %57 = vector.load %arg5[%c0_32, %c0_33] : memref<128x128xf32, #tpu.memory_space<vmem>>, vector<128x128xf32>
    %cst_34 = arith.constant dense<0.000000e+00> : vector<8x128xf32>
    %58 = tpu.matmul %37, %54, %cst_34 {dimension_numbers = #tpu.dot_dimension_numbers<[1], [0], [0], [1], [0, 0, 1, 1], [], []>} : vector<8x128xf32>, vector<128x128xf32>, vector<8x128xf32> -> vector<8x128xf32>
    %cst_35 = arith.constant dense<0.000000e+00> : vector<8x128xf32>
    %59 = tpu.matmul %45, %55, %cst_35 {dimension_numbers = #tpu.dot_dimension_numbers<[1], [0], [0], [1], [0, 0, 1, 1], [], []>} : vector<8x128xf32>, vector<128x128xf32>, vector<8x128xf32> -> vector<8x128xf32>
    %cst_36 = arith.constant dense<0.000000e+00> : vector<8x128xf32>
    %60 = tpu.matmul %53, %55, %cst_36 {dimension_numbers = #tpu.dot_dimension_numbers<[1], [0], [0], [1], [0, 0, 1, 1], [], []>} : vector<8x128xf32>, vector<128x128xf32>, vector<8x128xf32> -> vector<8x128xf32>
    %61 = math.absf %58 : vector<8x128xf32>
    %cst_37 = arith.constant 5.000000e-01 : f32
    %62 = vector.broadcast %cst_37 : f32 to vector<8x128xf32>
    %63 = arith.cmpf olt, %61, %62 : vector<8x128xf32>
    %64 = arith.mulf %58, %58 : vector<8x128xf32>
    %65 = arith.mulf %64, %58 : vector<8x128xf32>
    %66 = arith.select %63, %65, %58 : vector<8x128xi1>, vector<8x128xf32>
    %67 = math.absf %59 : vector<8x128xf32>
    %cst_38 = arith.constant 5.000000e-01 : f32
    %68 = vector.broadcast %cst_38 : f32 to vector<8x128xf32>
    %69 = arith.cmpf olt, %67, %68 : vector<8x128xf32>
    %70 = arith.mulf %59, %59 : vector<8x128xf32>
    %71 = arith.mulf %70, %59 : vector<8x128xf32>
    %72 = arith.select %69, %71, %59 : vector<8x128xi1>, vector<8x128xf32>
    %73 = math.absf %60 : vector<8x128xf32>
    %cst_39 = arith.constant 5.000000e-01 : f32
    %74 = vector.broadcast %cst_39 : f32 to vector<8x128xf32>
    %75 = arith.cmpf olt, %73, %74 : vector<8x128xf32>
    %76 = arith.mulf %60, %60 : vector<8x128xf32>
    %77 = arith.mulf %76, %60 : vector<8x128xf32>
    %78 = arith.select %75, %77, %60 : vector<8x128xi1>, vector<8x128xf32>
    %cst_40 = arith.constant dense<0.000000e+00> : vector<8x128xf32>
    %79 = tpu.matmul %66, %56, %cst_40 {dimension_numbers = #tpu.dot_dimension_numbers<[1], [0], [0], [1], [0, 0, 1, 1], [], []>} : vector<8x128xf32>, vector<128x128xf32>, vector<8x128xf32> -> vector<8x128xf32>
    %cst_41 = arith.constant dense<0.000000e+00> : vector<8x128xf32>
    %80 = tpu.matmul %72, %57, %cst_41 {dimension_numbers = #tpu.dot_dimension_numbers<[1], [0], [0], [1], [0, 0, 1, 1], [], []>} : vector<8x128xf32>, vector<128x128xf32>, vector<8x128xf32> -> vector<8x128xf32>
    %cst_42 = arith.constant dense<0.000000e+00> : vector<8x128xf32>
    %81 = tpu.matmul %78, %57, %cst_42 {dimension_numbers = #tpu.dot_dimension_numbers<[1], [0], [0], [1], [0, 0, 1, 1], [], []>} : vector<8x128xf32>, vector<128x128xf32>, vector<8x128xf32> -> vector<8x128xf32>
    %cst_43 = arith.constant 1.40198755 : f32
    %82 = vector.broadcast %cst_43 : f32 to vector<8x128xf32>
    %83 = arith.mulf %82, %81 : vector<8x128xf32>
    %84 = arith.addf %79, %83 : vector<8x128xf32>
    %cst_44 = arith.constant 0.34411329 : f32
    %85 = vector.broadcast %cst_44 : f32 to vector<8x128xf32>
    %86 = arith.mulf %85, %80 : vector<8x128xf32>
    %87 = arith.subf %79, %86 : vector<8x128xf32>
    %cst_45 = arith.constant 0.714103818 : f32
    %88 = vector.broadcast %cst_45 : f32 to vector<8x128xf32>
    %89 = arith.mulf %88, %81 : vector<8x128xf32>
    %90 = arith.subf %87, %89 : vector<8x128xf32>
    %cst_46 = arith.constant 1.77197814 : f32
    %91 = vector.broadcast %cst_46 : f32 to vector<8x128xf32>
    %92 = arith.mulf %91, %80 : vector<8x128xf32>
    %93 = arith.addf %79, %92 : vector<8x128xf32>
    %cst_47 = arith.constant 0.00784313772 : f32
    %94 = vector.broadcast %cst_47 : f32 to vector<8x128xf32>
    %95 = arith.mulf %84, %94 : vector<8x128xf32>
    %cst_48 = arith.constant 1.000000e+00 : f32
    %96 = vector.broadcast %cst_48 : f32 to vector<8x128xf32>
    %97 = arith.subf %95, %96 : vector<8x128xf32>
    %cst_49 = arith.constant -1.000000e+00 : f32
    %cst_50 = arith.constant 1.000000e+00 : f32
    %98 = vector.broadcast %cst_49 : f32 to vector<8x128xf32>
    %99 = arith.maximumf %98, %97 : vector<8x128xf32>
    %100 = vector.broadcast %cst_50 : f32 to vector<8x128xf32>
    %101 = arith.minimumf %100, %99 : vector<8x128xf32>
    %c0_51 = arith.constant 0 : index
    %c0_52 = arith.constant 0 : index
    %c0_53 = arith.constant 0 : index
    %102 = vector.load %arg6[%c0_51, %c0_52, %c0_53] : memref<3x8x128xf32, #tpu.memory_space<vmem>>, vector<1x8x128xf32>
    %103 = vector.shape_cast %102 : vector<1x8x128xf32> to vector<8x128xf32>
    %104 = vector.shape_cast %101 : vector<8x128xf32> to vector<1x8x128xf32>
    tpu.vector_store %arg6[%c0_51, %c0_52, %c0_53], %104 {strides = array<i32>} : memref<3x8x128xf32, #tpu.memory_space<vmem>>, vector<1x8x128xf32>,
    %cst_54 = arith.constant 0.00784313772 : f32
    %105 = vector.broadcast %cst_54 : f32 to vector<8x128xf32>
    %106 = arith.mulf %90, %105 : vector<8x128xf32>
    %cst_55 = arith.constant 1.000000e+00 : f32
    %107 = vector.broadcast %cst_55 : f32 to vector<8x128xf32>
    %108 = arith.subf %106, %107 : vector<8x128xf32>
    %cst_56 = arith.constant -1.000000e+00 : f32
    %cst_57 = arith.constant 1.000000e+00 : f32
    %109 = vector.broadcast %cst_56 : f32 to vector<8x128xf32>
    %110 = arith.maximumf %109, %108 : vector<8x128xf32>
    %111 = vector.broadcast %cst_57 : f32 to vector<8x128xf32>
    %112 = arith.minimumf %111, %110 : vector<8x128xf32>
    %c1_58 = arith.constant 1 : index
    %c0_59 = arith.constant 0 : index
    %c0_60 = arith.constant 0 : index
    %113 = vector.load %arg6[%c1_58, %c0_59, %c0_60] : memref<3x8x128xf32, #tpu.memory_space<vmem>>, vector<1x8x128xf32>
    %114 = vector.shape_cast %113 : vector<1x8x128xf32> to vector<8x128xf32>
    %115 = vector.shape_cast %112 : vector<8x128xf32> to vector<1x8x128xf32>
    tpu.vector_store %arg6[%c1_58, %c0_59, %c0_60], %115 {strides = array<i32>} : memref<3x8x128xf32, #tpu.memory_space<vmem>>, vector<1x8x128xf32>,
    %cst_61 = arith.constant 0.00784313772 : f32
    %116 = vector.broadcast %cst_61 : f32 to vector<8x128xf32>
    %117 = arith.mulf %93, %116 : vector<8x128xf32>
    %cst_62 = arith.constant 1.000000e+00 : f32
    %118 = vector.broadcast %cst_62 : f32 to vector<8x128xf32>
    %119 = arith.subf %117, %118 : vector<8x128xf32>
    %cst_63 = arith.constant -1.000000e+00 : f32
    %cst_64 = arith.constant 1.000000e+00 : f32
    %120 = vector.broadcast %cst_63 : f32 to vector<8x128xf32>
    %121 = arith.maximumf %120, %119 : vector<8x128xf32>
    %122 = vector.broadcast %cst_64 : f32 to vector<8x128xf32>
    %123 = arith.minimumf %122, %121 : vector<8x128xf32>
    %c2_65 = arith.constant 2 : index
    %c0_66 = arith.constant 0 : index
    %c0_67 = arith.constant 0 : index
    %124 = vector.load %arg6[%c2_65, %c0_66, %c0_67] : memref<3x8x128xf32, #tpu.memory_space<vmem>>, vector<1x8x128xf32>
    %125 = vector.shape_cast %124 : vector<1x8x128xf32> to vector<8x128xf32>
    %126 = vector.shape_cast %123 : vector<8x128xf32> to vector<1x8x128xf32>
    tpu.vector_store %arg6[%c2_65, %c0_66, %c0_67], %126 {strides = array<i32>} : memref<3x8x128xf32, #tpu.memory_space<vmem>>, vector<1x8x128xf32>,
    return
  }
  func.func @transform_0(%arg0: i32) -> (i32, i32, i32) {
    %c0_i32 = arith.constant 0 : i32
    %c0_i32_0 = arith.constant 0 : i32
    %c0_i32_1 = arith.constant 0 : i32
    return %c0_i32, %arg0, %c0_i32_0 : i32, i32, i32
  }
  func.func @transform_1(%arg0: i32) -> (i32, i32) {
    %c0_i32 = arith.constant 0 : i32
    %c0_i32_0 = arith.constant 0 : i32
    %c0_i32_1 = arith.constant 0 : i32
    return %c0_i32, %c0_i32_0 : i32, i32
  }
  func.func @transform_2(%arg0: i32) -> (i32, i32) {
    %c0_i32 = arith.constant 0 : i32
    %c0_i32_0 = arith.constant 0 : i32
    %c0_i32_1 = arith.constant 0 : i32
    return %c0_i32, %c0_i32_0 : i32, i32
  }
  func.func @transform_3(%arg0: i32) -> (i32, i32) {
    %c0_i32 = arith.constant 0 : i32
    %c0_i32_0 = arith.constant 0 : i32
    %c0_i32_1 = arith.constant 0 : i32
    return %c0_i32, %c0_i32_0 : i32, i32
  }
  func.func @transform_4(%arg0: i32) -> (i32, i32) {
    %c0_i32 = arith.constant 0 : i32
    %c0_i32_0 = arith.constant 0 : i32
    %c0_i32_1 = arith.constant 0 : i32
    return %c0_i32, %c0_i32_0 : i32, i32
  }
  func.func @transform_5(%arg0: i32) -> (i32, i32, i32) {
    %c0_i32 = arith.constant 0 : i32
    %c0_i32_0 = arith.constant 0 : i32
    %c0_i32_1 = arith.constant 0 : i32
    return %c0_i32, %arg0, %c0_i32_0 : i32, i32, i32
  }
}

</mosaic_0001>

<bundles_post_ra>
// kernel: jpeg_ss.1
= control target key start
LH: loop header
LB: loop body
LE: loop exit
PB: predicated region body
PF: predicated region fallthrough
CT: control target
= control target key end

     0   :  { %v1052_v0 = vmov 0.0|0.0   ;;  %vm1053_vm0 = vmmov 0   ;;  %v1054_v8 = vmov 0.0   ;;  %s1402_s1 = inlined_call_operand.vmem [shape: f32[128,128], index: 1, kind: input, shape index: {}]   ;;  %s1403_s2 = inlined_call_operand.vmem [shape: f32[128,128], index: 2, kind: input, shape index: {}]   ;;  %s1404_s0 = inlined_call_operand.vmem [shape: f32[3,8,128], index: 0, kind: input, shape index: {}]   ;;  %s1405_s3 = inlined_call_operand.vmem [shape: f32[128,128], index: 3, kind: input, shape index: {}]   ;;  %s1406_s4 = inlined_call_operand.vmem [shape: f32[128,128], index: 4, kind: input, shape index: {}]   ;;  %s1407_s5 = inlined_call_operand.vmem [shape: f32[3,8,128], index: 5, kind: output, shape index: {}]  }
   0x1   :  { %905 = vmatprep.subr.bf16.mxu0 %v1052_v0  ;;  %929 = vmatprep.subr.bf16.mxu1 %v1052_v0  ;;  %v52_v1 = vld [vmem:[%s1402_s1] sm:$0xff]  ;;  %v53_v2 = vld [vmem:[%s1402_s1 + $0x8] sm:$0xff]  ;;  %v54_v6 = vld [vmem:[%s1402_s1 + $0x10] sm:$0xff] }
   0x2   :  { %v68_v3 = vld [vmem:[%s1403_s2] sm:$0xff]  ;;  %v906_v4 = vpack.c.bf16 %v53_v2, %v52_v1  ;;  %v69_v5 = vld [vmem:[%s1403_s2 + $0x8] sm:$0xff]  ;;  %v55_v7 = vld [vmem:[%s1402_s1 + $0x18] sm:$0xff]  ;;  %727 = vmatprep.mubr.msk.f32.mxu0 %vm1053_vm0, %v1054_v8  ;;  %762 = vmatprep.mubr.msk.f32.mxu1 %vm1053_vm0, %v1054_v8 }
   0x3   :  { %v1109_v9 = vpack.c.bf16 %v69_v5, %v68_v3  ;;  %v70_v10 = vld [vmem:[%s1403_s2 + $0x10] sm:$0xff]  ;;  %v71_v11 = vld [vmem:[%s1403_s2 + $0x18] sm:$0xff]  ;;  %v909_v12 = vpack.c.bf16 %v55_v7, %v54_v6  ;;  %v56_v14 = vld [vmem:[%s1402_s1 + $0x20] sm:$0xff] }
   0x4   :  { %907 = vmatpush3.bf16.msra.mxu0 %v906_v4  ;;  %v1119_v13 = vpack.c.bf16 %v71_v11, %v70_v10  ;;  %v57_v15 = vld [vmem:[%s1402_s1 + $0x28] sm:$0xff]  ;;  %v72_v16 = vld [vmem:[%s1403_s2 + $0x20] sm:$0xff]  ;;  %v58_v20 = vld [vmem:[%s1402_s1 + $0x30] sm:$0xff] }
   0x5   :  { %931 = vmatpush3.bf16.msra.mxu1 %v1109_v9  ;;  %908 = vmatprep.subr.bf16.mxu0 %v1052_v0  ;;  %v73_v17 = vld [vmem:[%s1403_s2 + $0x28] sm:$0xff]  ;;  %v912_v18 = vpack.c.bf16 %v57_v15, %v56_v14  ;;  %v59_v21 = vld [vmem:[%s1402_s1 + $0x38] sm:$0xff]  ;;  %v74_v22 = vld [vmem:[%s1403_s2 + $0x30] sm:$0xff] }
   0x6   :  { %932 = vmatprep.subr.bf16.mxu1 %v1052_v0  ;;  %v1136_v19 = vpack.c.bf16 %v73_v17, %v72_v16  ;;  %v75_v23 = vld [vmem:[%s1403_s2 + $0x38] sm:$0xff]  ;;  %v20_v24 = vld [vmem:[%s1404_s0] sm:$0xff]  ;;  %v915_v25 = vpack.c.bf16 %v59_v21, %v58_v20  ;;  %v581_v27 = vld [vmem:[%s1404_s0 + $0x8] sm:$0xff] }
   0x7   :  { %v580_v26 = vclamps-f32 %v20_v24, 1.0  ;;  %v583_v28 = vld [vmem:[%s1404_s0 + $0x10] sm:$0xff]  ;;  %v1162_v29 = vpack.c.bf16 %v75_v23, %v74_v22  ;;  %v60_v30 = vld [vmem:[%s1402_s1 + $0x40] sm:$0xff]  ;;  %v61_v31 = vld [vmem:[%s1402_s1 + $0x48] sm:$0xff]  ;;  %v582_v32 = vclamps-f32 %v581_v27, 1.0 }
   0x8   :  { %910 = vmatpush3.bf16.msra.mxu0 %v909_v12  ;;  %v76_v33 = vld [vmem:[%s1403_s2 + $0x40] sm:$0xff]  ;;  %v77_v34 = vld [vmem:[%s1403_s2 + $0x48] sm:$0xff]  ;;  %v584_v37 = vclamps-f32 %v583_v28, 1.0  ;;  %v918_v38 = vpack.c.bf16 %v61_v31, %v60_v30  ;;  %v62_v40 = vld [vmem:[%s1402_s1 + $0x50] sm:$0xff] }
   0x9   :  { %934 = vmatpush3.bf16.msra.mxu1 %v1119_v13  ;;  %911 = vmatprep.subr.bf16.mxu0 %v1052_v0  ;;  %v23_v35 = vadd.f32 1.0, %v580_v26  ;;  %v29_v36 = vadd.f32 1.0, %v582_v32  ;;  %v1179_v39 = vpack.c.bf16 %v77_v34, %v76_v33  ;;  %v63_v41 = vld [vmem:[%s1402_s1 + $0x58] sm:$0xff]  ;;  %v78_v42 = vld [vmem:[%s1403_s2 + $0x50] sm:$0xff]  ;;  %v64_v49 = vld [vmem:[%s1402_s1 + $0x60] sm:$0xff] }
   0xa   :  { %935 = vmatprep.subr.bf16.mxu1 %v1052_v0  ;;  %v79_v43 = vld [vmem:[%s1403_s2 + $0x58] sm:$0xff]  ;;  %v35_v46 = vadd.f32 1.0, %v584_v37  ;;  %v921_v47 = vpack.c.bf16 %v63_v41, %v62_v40  ;;  %v65_v50 = vld [vmem:[%s1402_s1 + $0x68] sm:$0xff]  ;;  %v80_v51 = vld [vmem:[%s1403_s2 + $0x60] sm:$0xff] }
   0xb   :  { %v1194_v44 = vmul.f32 127.5, %v23_v35  ;;  %v1196_v45 = vmul.f32 127.5, %v29_v36  ;;  %v1200_v48 = vpack.c.bf16 %v79_v43, %v78_v42  ;;  %v81_v52 = vld [vmem:[%s1403_s2 + $0x68] sm:$0xff]  ;;  %v924_v56 = vpack.c.bf16 %v65_v50, %v64_v49  ;;  %v66_v60 = vld [vmem:[%s1402_s1 + $0x70] sm:$0xff]  ;;  %v67_v61 = vld [vmem:[%s1402_s1 + $0x78] sm:$0xff] }
   0xc   :  { %913 = vmatpush3.bf16.msra.mxu0 %v912_v18  ;;  %v1215_v53 = vmul.f32 127.5, %v35_v46  ;;  %v1223_v59 = vpack.c.bf16 %v81_v52, %v80_v51  ;;  %v82_v62 = vld [vmem:[%s1403_s2 + $0x70] sm:$0xff]  ;;  %v83_v63 = vld [vmem:[%s1403_s2 + $0x78] sm:$0xff]  ;;  %v927_v3 = vpack.c.bf16 %v67_v61, %v66_v60  ;;  %v84_v10 = vld [vmem:[%s1405_s3] sm:$0xff] }
   0xd   :  { %937 = vmatpush3.bf16.msra.mxu1 %v1136_v19  ;;  %914 = vmatprep.subr.bf16.mxu0 %v1052_v0  ;;  %v37_v54 = vmul.f32 0.299, %v1194_v44  ;;  %v38_v55 = vmul.f32 0.587, %v1196_v45  ;;  %v42_v57 = vmul.f32 -0.1687, %v1194_v44  ;;  %v1242_v6 = vpack.c.bf16 %v83_v63, %v82_v62 }
   0xe   :  { %938 = vmatprep.subr.bf16.mxu1 %v1052_v0  ;;  %v43_v58 = vmul.f32 0.3313, %v1196_v45  ;;  %v40_v2 = vmul.f32 0.114, %v1215_v53  ;;  %v45_v5 = vmul.f32 0.5, %v1215_v53  ;;  %v85_v11 = vld [vmem:[%s1405_s3 + $0x8] sm:$0xff] }
   0xf   :  { %v39_v1 = vadd.f32 %v38_v55, %v37_v54  ;;  %v978_v14 = vpack.c.bf16 %v85_v11, %v84_v10  ;;  %v86_v15 = vld [vmem:[%s1405_s3 + $0x10] sm:$0xff]  ;;  %v87_v16 = vld [vmem:[%s1405_s3 + $0x18] sm:$0xff]  ;;  %v88_v18 = vld [vmem:[%s1405_s3 + $0x20] sm:$0xff]  ;;  %v47_v28 = vmul.f32 0.5, %v1194_v44  ;;  %v50_v34 = vmul.f32 0.0813, %v1215_v53 }
  0x10   :  { %916 = vmatpush3.bf16.msra.mxu0 %v915_v25  ;;  %v44_v4 = vsub.f32 %v42_v57, %v43_v58  ;;  %v981_v17 = vpack.c.bf16 %v87_v16, %v86_v15  ;;  %v90_v21 = vld [vmem:[%s1405_s3 + $0x30] sm:$0xff]  ;;  %v91_v22 = vld [vmem:[%s1405_s3 + $0x38] sm:$0xff]  ;;  %v92_v23 = vld [vmem:[%s1405_s3 + $0x40] sm:$0xff] }
  0x11   :  { %940 = vmatpush3.bf16.msra.mxu1 %v1162_v29  ;;  %917 = vmatprep.subr.bf16.mxu0 %v1052_v0  ;;  %v41_v7 = vadd.f32 %v40_v2, %v39_v1  ;;  %v93_v24 = vld [vmem:[%s1405_s3 + $0x48] sm:$0xff]  ;;  %v94_v25 = vld [vmem:[%s1405_s3 + $0x50] sm:$0xff]  ;;  %v95_v26 = vld [vmem:[%s1405_s3 + $0x58] sm:$0xff] }
  0x12   :  { %941 = vmatprep.subr.bf16.mxu1 %v1052_v0  ;;  %v46_v12 = vadd.f32 %v45_v5, %v44_v4  ;;  %v993_v27 = vpack.c.bf16 %v95_v26, %v94_v25  ;;  %v96_v30 = vld [vmem:[%s1405_s3 + $0x60] sm:$0xff]  ;;  %v97_v31 = vld [vmem:[%s1405_s3 + $0x68] sm:$0xff]  ;;  %v103_v40 = vld [vmem:[%s1406_s4 + $0x18] sm:$0xff] }
  0x13   :  { %v996_v32 = vpack.c.bf16 %v97_v31, %v96_v30  ;;  %v100_v35 = vld [vmem:[%s1406_s4] sm:$0xff]  ;;  %v101_v36 = vld [vmem:[%s1406_s4 + $0x8] sm:$0xff]  ;;  %v107_v46 = vld [vmem:[%s1406_s4 + $0x38] sm:$0xff] }
  0x14   :  { %919 = vmatpush3.bf16.msra.mxu0 %v918_v38  ;;  %v1002_v38 = vpack.c.bf16 %v101_v36, %v100_v35  ;;  %v104_v42 = vld [vmem:[%s1406_s4 + $0x20] sm:$0xff]  ;;  %v105_v43 = vld [vmem:[%s1406_s4 + $0x28] sm:$0xff]  ;;  %v110_v51 = vld [vmem:[%s1406_s4 + $0x50] sm:$0xff] }
  0x15   :  { %943 = vmatpush3.bf16.msra.mxu1 %v1179_v39  ;;  %920 = vmatprep.subr.bf16.mxu0 %v1052_v0  ;;  %v1008_v44 = vpack.c.bf16 %v105_v43, %v104_v42  ;;  %v109_v49 = vld [vmem:[%s1406_s4 + $0x48] sm:$0xff]  ;;  %v111_v52 = vld [vmem:[%s1406_s4 + $0x58] sm:$0xff]  ;;  %v112_v54 = vld [vmem:[%s1406_s4 + $0x60] sm:$0xff] }
  0x16   :  { %944 = vmatprep.subr.bf16.mxu1 %v1052_v0  ;;  %v1017_v53 = vpack.c.bf16 %v111_v52, %v110_v51  ;;  %v113_v55 = vld [vmem:[%s1406_s4 + $0x68] sm:$0xff]  ;;  %v98_v57 = vld [vmem:[%s1405_s3 + $0x70] sm:$0xff]  ;;  %v99_v58 = vld [vmem:[%s1405_s3 + $0x78] sm:$0xff] }
  0x17   :  { %v999_v60 = vpack.c.bf16 %v99_v58, %v98_v57  ;;  %v115_v61 = vld [vmem:[%s1406_s4 + $0x78] sm:$0xff] }
  0x18   :  { %922 = vmatpush3.bf16.msra.mxu0 %v921_v47 }
  0x19   :  { %946 = vmatpush3.bf16.msra.mxu1 %v1200_v48  ;;  %923 = vmatprep.subr.bf16.mxu0 %v1052_v0 }
  0x1a   :  { %947 = vmatprep.subr.bf16.mxu1 %v1052_v0 }
  0x1c   :  { %925 = vmatpush3.bf16.msra.mxu0 %v924_v56  ;;  %v1020_v56 = vpack.c.bf16 %v113_v55, %v112_v54 }
  0x1d   :  { %949 = vmatpush3.bf16.msra.mxu1 %v1223_v59  ;;  %926 = vmatprep.subr.bf16.mxu0 %v1052_v0 }
  0x1e   :  { %950 = vmatprep.subr.bf16.mxu1 %v1052_v0 }
  0x20   :  { %928 = vmatpush3.bf16.msra.mxu0 %v927_v3 }
  0x21   :  { %952 = vmatpush3.bf16.msra.mxu1 %v1242_v6  ;;  %953 = vmatprep.subr.bf16.mxu0 %v1052_v0 }
  0x22   :  { %977 = vmatprep.subr.bf16.mxu1 %v1052_v0 }
  0x23   :  { %728 = vmatmul.mubr.f32.vlgmr.msra.gmra.mrb[0].mxu0 %v41_v7 }
  0x24   :  { %763 = vmatmul.mubr.f32.vlgmr.msra.gmra.mrb[0].mxu1 %v46_v12  ;;  %955 = vmatpush3.bf16.msra.mxu0 %v1109_v9  ;;  %v89_v9 = vld [vmem:[%s1405_s3 + $0x28] sm:$0xff] }
  0x25   :  { %956 = vmatprep.subr.bf16.mxu0 %v1052_v0  ;;  %797 = vmatprep.mubr.msk.f32.mxu0 %vm1053_vm0, %v1054_v8  ;;  %v984_v20 = vpack.c.bf16 %v89_v9, %v88_v18 }
  0x26   :  { %979 = vmatpush3.bf16.msra.mxu1 %v978_v14  ;;  %832 = vmatprep.mubr.msk.f32.mxu1 %vm1053_vm0, %v1054_v8 }
  0x27   :  { %980 = vmatprep.subr.bf16.mxu1 %v1052_v0 }
  0x28   :  { %958 = vmatpush3.bf16.msra.mxu0 %v1119_v13  ;;  %v987_v13 = vpack.c.bf16 %v91_v22, %v90_v21 }
  0x29   :  { %959 = vmatprep.subr.bf16.mxu0 %v1052_v0 }
  0x2a   :  { %982 = vmatpush3.bf16.msra.mxu1 %v981_v17 }
  0x2b   :  { %983 = vmatprep.subr.bf16.mxu1 %v1052_v0 }
  0x2c   :  { %961 = vmatpush3.bf16.msra.mxu0 %v1136_v19  ;;  %v990_v19 = vpack.c.bf16 %v93_v24, %v92_v23 }
  0x2d   :  { %962 = vmatprep.subr.bf16.mxu0 %v1052_v0 }
  0x2e   :  { %985 = vmatpush3.bf16.msra.mxu1 %v984_v20 }
  0x2f   :  { %986 = vmatprep.subr.bf16.mxu1 %v1052_v0 }
  0x30   :  { %964 = vmatpush3.bf16.msra.mxu0 %v1162_v29  ;;  %v48_v29 = vmul.f32 0.4187, %v1196_v45  ;;  %v106_v45 = vld [vmem:[%s1406_s4 + $0x30] sm:$0xff] }
  0x31   :  { %965 = vmatprep.subr.bf16.mxu0 %v1052_v0  ;;  %v1011_v47 = vpack.c.bf16 %v107_v46, %v106_v45 }
  0x32   :  { %988 = vmatpush3.bf16.msra.mxu1 %v987_v13  ;;  %v49_v33 = vsub.f32 %v47_v28, %v48_v29 }
  0x33   :  { %989 = vmatprep.subr.bf16.mxu1 %v1052_v0 }
  0x34   :  { %967 = vmatpush3.bf16.msra.mxu0 %v1179_v39  ;;  %v51_v37 = vsub.f32 %v49_v33, %v50_v34  ;;  %v102_v39 = vld [vmem:[%s1406_s4 + $0x10] sm:$0xff] }
  0x35   :  { %968 = vmatprep.subr.bf16.mxu0 %v1052_v0  ;;  %v1005_v41 = vpack.c.bf16 %v103_v40, %v102_v39 }
  0x36   :  { %991 = vmatpush3.bf16.msra.mxu1 %v990_v19 }
  0x37   :  { %992 = vmatprep.subr.bf16.mxu1 %v1052_v0 }
  0x38   :  { %970 = vmatpush3.bf16.msra.mxu0 %v1200_v48  ;;  %v108_v48 = vld [vmem:[%s1406_s4 + $0x40] sm:$0xff] }
  0x39   :  { %971 = vmatprep.subr.bf16.mxu0 %v1052_v0  ;;  %v1014_v50 = vpack.c.bf16 %v109_v49, %v108_v48 }
  0x3a   :  { %994 = vmatpush3.bf16.msra.mxu1 %v993_v27 }
  0x3b   :  { %995 = vmatprep.subr.bf16.mxu1 %v1052_v0 }
  0x3c   :  { %973 = vmatpush3.bf16.msra.mxu0 %v1223_v59  ;;  %v114_v59 = vld [vmem:[%s1406_s4 + $0x70] sm:$0xff] }
  0x3d   :  { %974 = vmatprep.subr.bf16.mxu0 %v1052_v0  ;;  %v1023_v62 = vpack.c.bf16 %v115_v61, %v114_v59 }
  0x3e   :  { %997 = vmatpush3.bf16.msra.mxu1 %v996_v32 }
  0x3f   :  { %998 = vmatprep.subr.bf16.mxu1 %v1052_v0 }
  0x40   :  { %976 = vmatpush3.bf16.msra.mxu0 %v1242_v6 }
  0x41   :  { %1001 = vmatprep.subr.bf16.mxu0 %v1052_v0 }
  0x42   :  { %1000 = vmatpush3.bf16.msra.mxu1 %v999_v60 }
  0x43   :  { %798 = vmatmul.mubr.f32.vlgmr.msra.gmra.mrb[2].mxu0 %v51_v37  ;;  %1025 = vmatprep.subr.bf16.mxu1 %v1052_v0 }
  0x44   :  { %1003 = vmatpush3.bf16.msra.mxu0 %v1002_v38  ;;  %867 = vmatprep.mubr.msk.f32.mxu0 %vm1053_vm0, %v1054_v8 }
  0x45   :  { %1004 = vmatprep.subr.bf16.mxu0 %v1052_v0 }
  0x48   :  { %1006 = vmatpush3.bf16.msra.mxu0 %v1005_v41 }
  0x49   :  { %1007 = vmatprep.subr.bf16.mxu0 %v1052_v0 }
  0x4c   :  { %1009 = vmatpush3.bf16.msra.mxu0 %v1008_v44 }
  0x4d   :  { %1010 = vmatprep.subr.bf16.mxu0 %v1052_v0 }
  0x50   :  { %1012 = vmatpush3.bf16.msra.mxu0 %v1011_v47 }
  0x51   :  { %1013 = vmatprep.subr.bf16.mxu0 %v1052_v0 }
  0x54   :  { %1015 = vmatpush3.bf16.msra.mxu0 %v1014_v50 }
  0x55   :  { %1016 = vmatprep.subr.bf16.mxu0 %v1052_v0 }
  0x58   :  { %1018 = vmatpush3.bf16.msra.mxu0 %v1017_v53 }
  0x59   :  { %1019 = vmatprep.subr.bf16.mxu0 %v1052_v0 }
  0x5c   :  { %1021 = vmatpush3.bf16.msra.mxu0 %v1020_v56 }
  0x5d   :  { %1022 = vmatprep.subr.bf16.mxu0 %v1052_v0 }
  0x60   :  { %1024 = vmatpush3.bf16.msra.mxu0 %v1023_v62 }
  0xf6   :  { %v182_v63 = vpop.f32.mrb[0].mxu0 }
  0xf7   :  { %v326_v1 = vand.u32 2147483647, %v182_v63  ;;  %v328_v2 = vmul.f32 %v182_v63, %v182_v63  ;;  %v252_v3 = vpop.f32.mrb[0].mxu1  ;;  %v729_v4 = vpop.f32.mrb[1].mxu0 }
  0xf8   :  { %v331_v5 = vand.u32 2147483647, %v252_v3  ;;  %v333_v6 = vmul.f32 %v252_v3, %v252_v3  ;;  %v764_v7 = vpop.f32.mrb[1].mxu1 }
  0xf9   :  { %v329_v10 = vmul.f32 %v328_v2, %v182_v63  ;;  %vm327_vm1 = vcmp.lt.f32.partialorder %v326_v1, 0.5 }
  0xfa   :  { %v334_v11 = vmul.f32 %v333_v6, %v252_v3  ;;  %vm332_vm2 = vcmp.lt.f32.partialorder %v331_v5, 0.5 }
  0xfb   :  { %v330_v12 = vsel %vm327_vm1, %v329_v10, %v182_v63 }
  0xfc   :  { %833 = vmatmul.mubr.f32.vlgmr.msra.gmra.mrb[2].mxu1 %v330_v12  ;;  %v335_v14 = vsel %vm332_vm2, %v334_v11, %v252_v3 }
  0xfd   :  { %868 = vmatmul.mubr.f32.vlgmr.msra.gmra.mrb[4].mxu0 %v335_v14  ;;  %1027 = vmatpush3.bf16.msra.mxu1 %v1002_v38 }
  0xfe   :  { %1028 = vmatprep.subr.bf16.mxu1 %v1052_v0  ;;  %902 = vmatprep.mubr.msk.f32.mxu1 %vm1053_vm0, %v1054_v8 }
 0x101   :  { %1030 = vmatpush3.bf16.msra.mxu1 %v1005_v41 }
 0x102   :  { %1031 = vmatprep.subr.bf16.mxu1 %v1052_v0 }
 0x105   :  { %1033 = vmatpush3.bf16.msra.mxu1 %v1008_v44 }
 0x106   :  { %1034 = vmatprep.subr.bf16.mxu1 %v1052_v0 }
 0x109   :  { %1036 = vmatpush3.bf16.msra.mxu1 %v1011_v47 }
 0x10a   :  { %1037 = vmatprep.subr.bf16.mxu1 %v1052_v0 }
 0x10d   :  { %1039 = vmatpush3.bf16.msra.mxu1 %v1014_v50 }
 0x10e   :  { %1040 = vmatprep.subr.bf16.mxu1 %v1052_v0 }
 0x111   :  { %1042 = vmatpush3.bf16.msra.mxu1 %v1017_v53 }
 0x112   :  { %1043 = vmatprep.subr.bf16.mxu1 %v1052_v0 }
 0x115   :  { %1045 = vmatpush3.bf16.msra.mxu1 %v1020_v56 }
 0x116   :  { %v322_v15 = vpop.f32.mrb[2].mxu0  ;;  %1046 = vmatprep.subr.bf16.mxu1 %v1052_v0 }
 0x117   :  { %v336_v8 = vand.u32 2147483647, %v322_v15  ;;  %v338_v16 = vmul.f32 %v322_v15, %v322_v15  ;;  %v799_v17 = vpop.f32.mrb[3].mxu0 }
 0x119   :  { %v339_v18 = vmul.f32 %v338_v16, %v322_v15  ;;  %1048 = vmatpush3.bf16.msra.mxu1 %v1023_v62  ;;  %vm337_vm3 = vcmp.lt.f32.partialorder %v336_v8, 0.5 }
 0x11b   :  { %v340_v9 = vsel %vm337_vm3, %v339_v18, %v322_v15 }
 0x11c   :  { %903 = vmatmul.mubr.f32.vlgmr.msra.gmra.mrb[4].mxu1 %v340_v9 }
 0x1cf   :  { %v407_v20 = vpop.f32.mrb[2].mxu1 }
 0x1d0   :  { %v477_v21 = vpop.f32.mrb[4].mxu0  ;;  %v834_v22 = vpop.f32.mrb[3].mxu1 }
 0x1d1   :  { %v553_v13 = vmul.f32 0.3441133, %v477_v21  ;;  %v557_v23 = vmul.f32 1.7719781, %v477_v21  ;;  %v869_v24 = vpop.f32.mrb[5].mxu0 }
 0x1d3   :  { %v554_v19 = vsub.f32 %v407_v20, %v553_v13  ;;  %v558_v25 = vadd.f32 %v557_v23, %v407_v20 }
 0x1d5   :  { %v570_v26 = vmul.f32 0.007843138, %v558_v25 }
 0x1d7   :  { %v590_v27 = vadd.f32 -1.0, %v570_v26 }
 0x1d9   :  { %v591_v28 = vclamps-f32 %v590_v27, 1.0 }
 0x1db   :  { %592 = vst [vmem:[%s1407_s5 + $0x10] sm:$0xff] %v591_v28 }
 0x1ef   :  { %v547_v0 = vpop.f32.mrb[4].mxu1 }
 0x1f0   :  { %v551_v29 = vmul.f32 1.4019876, %v547_v0  ;;  %v555_v30 = vmul.f32 0.7141038, %v547_v0  ;;  %v904_v31 = vpop.f32.mrb[5].mxu1 }
 0x1f2   :  { %v552_v32 = vadd.f32 %v551_v29, %v407_v20  ;;  %v556_v33 = vsub.f32 %v554_v19, %v555_v30 }
 0x1f4   :  { %v559_v34 = vmul.f32 0.007843138, %v552_v32  ;;  %v564_v35 = vmul.f32 0.007843138, %v556_v33 }
 0x1f6   :  { %v585_v36 = vadd.f32 -1.0, %v559_v34  ;;  %v587_v37 = vadd.f32 -1.0, %v564_v35 }
 0x1f8   :  { %v586_v38 = vclamps-f32 %v585_v36, 1.0  ;;  %v588_v39 = vclamps-f32 %v587_v37, 1.0 }
 0x1fa   :  { %563 = vst [vmem:[%s1407_s5] sm:$0xff] %v586_v38  ;;  %589 = vst [vmem:[%s1407_s5 + $0x8] sm:$0xff] %v588_v39 }

</bundles_post_ra>
